<compile_context>
chip_gen: v6e
topology: v6e:2x2x1
jax: 0.10.0
libtpu: 0.0.40
codegen_flags: <defaults>
</compile_context>

<pallas_src>
import jax
import jax.numpy as jnp
from jax.experimental import pallas as pl
from jax.experimental.pallas import tpu as pltpu

EMBEDDING_DIM = 300
HIDDEN_DIM = 256
OUTPUT_DIM = 128


def _round_up(x, m):
    return ((x + m - 1) // m) * m


def _query_tower_kernel(x_ref, w1_ref, b1_ref, w2_ref, b2_ref, o_ref):
    # First linear (bf16 operands, fp32 accumulation on the MXU) + bias + ReLU.
    h = jnp.dot(x_ref[...], w1_ref[...], preferred_element_type=jnp.float32)
    h = jnp.maximum(h + b1_ref[...], 0.0)          # fp32 bias add + ReLU on the VPU
    # Dropout(0.2): identity at inference.
    # Second linear: cast hidden to bf16 so the MXU runs its native cadence.
    h = h.astype(w2_ref.dtype)
    out = jnp.dot(h, w2_ref[...], preferred_element_type=jnp.float32)
    out = out + b2_ref[...]
    o_ref[...] = out.astype(o_ref.dtype)


def query_tower_forward(x, w1, b1, w2, b2, *, block_rows=512,
                        compute_dtype=jnp.bfloat16):
    """x: [B, D_in] float32. w1: [D_in, 256], w2: [256, 128], biases [1, out].

    block_rows: batch tile (keep a multiple of 16 for bf16; 256-1024 is the
    sweet spot, <=2048 keeps well under v5e's 16 MiB scoped-VMEM default).
    """
    B, d_in = x.shape
    d_hidden = w1.shape[1]
    d_out = w2.shape[1]

    # Pad the contraction dim to a multiple of 128 for unmasked lane loads /
    # clean MXU K tiling (zero padding => numerically exact for x @ w1).
    d_in_pad = _round_up(d_in, 128)

    # Batch tile: as large as requested, never larger than the padded batch.
    block = min(block_rows, _round_up(B, 16))
    B_pad = _round_up(B, block)

    x_p = jnp.zeros((B_pad, d_in_pad), compute_dtype)
    x_p = x_p.at[:B, :d_in].set(x.astype(compute_dtype))
    w1_p = jnp.zeros((d_in_pad, d_hidden), compute_dtype)
    w1_p = w1_p.at[:d_in, :].set(w1.astype(compute_dtype))
    w2_c = w2.astype(compute_dtype)
    b1_f = b1.astype(jnp.float32)
    b2_f = b2.astype(jnp.float32)

    grid = (B_pad // block,)

    out = pl.pallas_call(
        _query_tower_kernel,
        out_shape=jax.ShapeDtypeStruct((B_pad, d_out), jnp.float32),
        grid_spec=pltpu.PrefetchScalarGridSpec(
            num_scalar_prefetch=0,
            grid=grid,
            in_specs=[
                # Tile the batch; weights/biases are small (~0.3 MiB bf16) and
                # keep constant block indices so they stay resident in VMEM.
                pl.BlockSpec((block, d_in_pad), lambda i: (i, 0)),
                pl.BlockSpec((d_in_pad, d_hidden), lambda i: (0, 0)),
                pl.BlockSpec((1, d_hidden), lambda i: (0, 0)),
                pl.BlockSpec((d_hidden, d_out), lambda i: (0, 0)),
                pl.BlockSpec((1, d_out), lambda i: (0, 0)),
            ],
            out_specs=pl.BlockSpec((block, d_out), lambda i: (i, 0)),
        ),
        compiler_params=pltpu.CompilerParams(
            # Batch axis is independent -> lets v7x shard steps across its 2 TCs.
            dimension_semantics=("parallel",),
        ),
    )(x_p, w1_p, b1_f, w2_c, b2_f)

    return out[:B].astype(x.dtype)


def init_params(key):
    """Synthetic parameters matching nn.Linear shapes (stored pre-transposed
    as [in, out] since the kernel computes x @ W)."""
    k1, k2, k3, k4 = jax.random.split(key, 4)
    bound1 = 1.0 / (EMBEDDING_DIM ** 0.5)
    bound2 = 1.0 / (HIDDEN_DIM ** 0.5)
    w1 = jax.random.uniform(k1, (EMBEDDING_DIM, HIDDEN_DIM), jnp.float32,
                            -bound1, bound1)
    b1 = jax.random.uniform(k2, (1, HIDDEN_DIM), jnp.float32, -bound1, bound1)
    w2 = jax.random.uniform(k3, (HIDDEN_DIM, OUTPUT_DIM), jnp.float32,
                            -bound2, bound2)
    b2 = jax.random.uniform(k4, (1, OUTPUT_DIM), jnp.float32, -bound2, bound2)
    return w1, b1, w2, b2


def reference_forward(x, w1, b1, w2, b2):
    h = jnp.maximum(x @ w1 + b1, 0.0)
    return h @ w2 + b2


if __name__ == "__main__":
    key = jax.random.PRNGKey(0)
    kx, kp = jax.random.split(key)

    batch = 8  # small demo batch; kernel pads it to the tile internally
    x = jax.random.normal(kx, (batch, EMBEDDING_DIM), dtype=jnp.float32)
    w1, b1, w2, b2 = init_params(kp)

    out = query_tower_forward(x, w1, b1, w2, b2)
    out = jax.block_until_ready(out)

    ref = reference_forward(x, w1, b1, w2, b2)
    assert out.shape == (batch, OUTPUT_DIM)
    # bf16 operands with fp32 accumulation -> relaxed tolerance vs f32 reference.
    assert jnp.allclose(out, ref, atol=3e-2, rtol=3e-2), "mismatch vs reference"

    print("KERNEL_OK")
</pallas_src>

<mosaic_0001>
module attributes {stable_mosaic.version = 11 : i64} {
  func.func @_query_tower_kernel(%arg0: i32, %arg1: memref<16x384xbf16, #tpu.memory_space<vmem>>, %arg2: memref<384x256xbf16, #tpu.memory_space<vmem>>, %arg3: memref<1x256xf32, #tpu.memory_space<vmem>>, %arg4: memref<256x128xbf16, #tpu.memory_space<vmem>>, %arg5: memref<1x128xf32, #tpu.memory_space<vmem>>, %arg6: memref<16x128xf32, #tpu.memory_space<vmem>>) attributes {dimension_semantics = [#tpu.dimension_semantics<parallel>], iteration_bounds = array<i64: 1>, scalar_prefetch = 0 : i64, scratch_operands = 0 : i64, tpu.core_type = #tpu.core_type<tc>, window_params = [{transform_indices = @transform_0, window_bounds = array<i64: 16, 384>}, {pipeline_mode = #tpu.pipeline_mode<synchronous>, transform_indices = @transform_1, window_bounds = array<i64: 384, 256>}, {pipeline_mode = #tpu.pipeline_mode<synchronous>, transform_indices = @transform_2, window_bounds = array<i64: 1, 256>}, {pipeline_mode = #tpu.pipeline_mode<synchronous>, transform_indices = @transform_3, window_bounds = array<i64: 256, 128>}, {pipeline_mode = #tpu.pipeline_mode<synchronous>, transform_indices = @transform_4, window_bounds = array<i64: 1, 128>}, {transform_indices = @transform_5, window_bounds = array<i64: 16, 128>}]} {
    %c0 = arith.constant 0 : index
    %c0_0 = arith.constant 0 : index
    %0 = vector.load %arg1[%c0, %c0_0] : memref<16x384xbf16, #tpu.memory_space<vmem>>, vector<16x384xbf16>
    %c0_1 = arith.constant 0 : index
    %c0_2 = arith.constant 0 : index
    %1 = vector.load %arg2[%c0_1, %c0_2] : memref<384x256xbf16, #tpu.memory_space<vmem>>, vector<384x256xbf16>
    %cst = arith.constant dense<0.000000e+00> : vector<16x256xf32>
    %2 = tpu.matmul %0, %1, %cst {dimension_numbers = #tpu.dot_dimension_numbers<[1], [0], [0], [1], [0, 0, 1, 1], [], []>} : vector<16x384xbf16>, vector<384x256xbf16>, vector<16x256xf32> -> vector<16x256xf32>
    %c0_3 = arith.constant 0 : index
    %c0_4 = arith.constant 0 : index
    %3 = vector.load %arg3[%c0_3, %c0_4] : memref<1x256xf32, #tpu.memory_space<vmem>>, vector<1x256xf32>
    %4 = vector.broadcast %3 : vector<1x256xf32> to vector<16x256xf32>
    %5 = arith.addf %2, %4 : vector<16x256xf32>
    %cst_5 = arith.constant 0.000000e+00 : f32
    %6 = vector.broadcast %cst_5 : f32 to vector<16x256xf32>
    %7 = arith.maximumf %5, %6 : vector<16x256xf32>
    %8 = arith.truncf %7 : vector<16x256xf32> to vector<16x256xbf16>
    %c0_6 = arith.constant 0 : index
    %c0_7 = arith.constant 0 : index
    %9 = vector.load %arg4[%c0_6, %c0_7] : memref<256x128xbf16, #tpu.memory_space<vmem>>, vector<256x128xbf16>
    %cst_8 = arith.constant dense<0.000000e+00> : vector<16x128xf32>
    %10 = tpu.matmul %8, %9, %cst_8 {dimension_numbers = #tpu.dot_dimension_numbers<[1], [0], [0], [1], [0, 0, 1, 1], [], []>} : vector<16x256xbf16>, vector<256x128xbf16>, vector<16x128xf32> -> vector<16x128xf32>
    %c0_9 = arith.constant 0 : index
    %c0_10 = arith.constant 0 : index
    %11 = vector.load %arg5[%c0_9, %c0_10] : memref<1x128xf32, #tpu.memory_space<vmem>>, vector<1x128xf32>
    %12 = vector.broadcast %11 : vector<1x128xf32> to vector<16x128xf32>
    %13 = arith.addf %10, %12 : vector<16x128xf32>
    %c0_11 = arith.constant 0 : index
    %c0_12 = arith.constant 0 : index
    %14 = vector.load %arg6[%c0_11, %c0_12] : memref<16x128xf32, #tpu.memory_space<vmem>>, vector<16x128xf32>
    tpu.vector_store %arg6[%c0_11, %c0_12], %13 {strides = array<i32>} : memref<16x128xf32, #tpu.memory_space<vmem>>, vector<16x128xf32>,
    return
  }
  func.func @transform_0(%arg0: i32) -> (i32, i32) {
    %c0_i32 = arith.constant 0 : i32
    %c0_i32_0 = arith.constant 0 : i32
    return %arg0, %c0_i32 : i32, i32
  }
  func.func @transform_1(%arg0: i32) -> (i32, i32) {
    %c0_i32 = arith.constant 0 : i32
    %c0_i32_0 = arith.constant 0 : i32
    %c0_i32_1 = arith.constant 0 : i32
    return %c0_i32, %c0_i32_0 : i32, i32
  }
  func.func @transform_2(%arg0: i32) -> (i32, i32) {
    %c0_i32 = arith.constant 0 : i32
    %c0_i32_0 = arith.constant 0 : i32
    %c0_i32_1 = arith.constant 0 : i32
    return %c0_i32, %c0_i32_0 : i32, i32
  }
  func.func @transform_3(%arg0: i32) -> (i32, i32) {
    %c0_i32 = arith.constant 0 : i32
    %c0_i32_0 = arith.constant 0 : i32
    %c0_i32_1 = arith.constant 0 : i32
    return %c0_i32, %c0_i32_0 : i32, i32
  }
  func.func @transform_4(%arg0: i32) -> (i32, i32) {
    %c0_i32 = arith.constant 0 : i32
    %c0_i32_0 = arith.constant 0 : i32
    %c0_i32_1 = arith.constant 0 : i32
    return %c0_i32, %c0_i32_0 : i32, i32
  }
  func.func @transform_5(%arg0: i32) -> (i32, i32) {
    %c0_i32 = arith.constant 0 : i32
    %c0_i32_0 = arith.constant 0 : i32
    return %arg0, %c0_i32 : i32, i32
  }
}

</mosaic_0001>

<bundles_post_ra>
// kernel: tpu_custom_call.1
= control target key start
LH: loop header
LB: loop body
LE: loop exit
PB: predicated region body
PF: predicated region fallthrough
CT: control target
= control target key end

     0   :  { %10 = vsyncpa [#allocation3], 0  ;;  %s1015_s0 = inlined_call_operand.hbm [shape: bf16[16,384], index: 0, kind: input, shape index: {}]   ;;  %s1016_s1 = inlined_call_operand.hbm [shape: bf16[384,256], index: 1, kind: input, shape index: {}]   ;;  %s1017_s2 = inlined_call_operand.vmem [shape: f32[1,256], index: 2, kind: input, shape index: {}]   ;;  %s1018_s3 = inlined_call_operand.hbm [shape: bf16[256,128], index: 3, kind: input, shape index: {}]   ;;  %s1019_s4 = inlined_call_operand.vmem [shape: f32[1,128], index: 4, kind: input, shape index: {}]   ;;  %s1020_s5 = inlined_call_operand.hbm [shape: f32[16,128], index: 5, kind: output, shape index: {}]  }
   0x1   :  { %11 = vsyncpa [#allocation6], 0 }
   0x2   :  { %12 = vsyncpa [#allocation4], 0  ;;  %s950_s18 = smov [#allocation5]  }
   0x3   :  { %s30_s19 = sshll.u32 %s950_s18, 4  ;;  %s31_s19 = int_to_ptr.vmem [resolvable:$true] %s30_s19 }
   0x4   :  { %s872_s20 = scalar_lea.vmem %s31_s19, 6144  ;;  %p877_p1 = scmp.lt.s32.totalorder %s31_s19, %s31_s19 }
   0x5   :  { %p873_p0 = scmp.ne.s32.totalorder %s31_s19, %s872_s20  ;;  %p878_p2 = scmp.lt.s32.totalorder %s872_s20, %s872_s20 }
   0x7   :  { %p879_p3 = por %p878_p2, %p877_p1 }
   0x9   :  { %p880_p4 = pnand %p879_p3, %p873_p0 }
   0xb   :  { %883 = shalt.err (!%p880_p4)
}
   0xc   :  { %s951_s21 = smov 128   ;;  %s952_s22 = smov 8  }
   0xd   :  { %36 = dma.hbm_to_vmem [thread:$0]  %s1016_s1, 6144, %s31_s19, [#allocation6], %s951_s21, %s951_s21, %s952_s22  }
   0xe   :  { %s953_s25 = smov [#allocation2]  }
   0xf   :  { %s18_s26 = sshll.u32 %s953_s25, 4  ;;  %s19_s26 = int_to_ptr.vmem [resolvable:$true] %s18_s26 }
  0x10   :  { %s892_s27 = scalar_lea.vmem %s19_s26, 384  ;;  %p897_p6 = scmp.lt.s32.totalorder %s19_s26, %s19_s26 }
  0x11   :  { %p893_p5 = scmp.ne.s32.totalorder %s19_s26, %s892_s27  ;;  %p898_p7 = scmp.lt.s32.totalorder %s892_s27, %s892_s27 }
  0x13   :  { %p899_p8 = por %p898_p7, %p897_p6 }
  0x15   :  { %p900_p9 = pnand %p899_p8, %p893_p5 }
  0x17   :  { %903 = shalt.err (!%p900_p9)
}
  0x18   :  { %s954_s28 = smov 192   ;;  %s955_s29 = smov 12  }
  0x19   :  { %24 = dma.hbm_to_vmem [thread:$0]  %s1015_s0, 384, %s19_s26, [#allocation3], %s954_s28, %s954_s28, %s955_s29  }
  0x1a   :  { %s956_s7 = smov [#allocation7]  }
  0x1b   :  { %s44_s8 = sshll.u32 %s956_s7, 4  ;;  %s45_s8 = int_to_ptr.vmem [resolvable:$true] %s44_s8 }
  0x1c   :  { %s912_s1 = scalar_lea.vmem %s45_s8, 2048  ;;  %p917_p11 = scmp.lt.s32.totalorder %s45_s8, %s45_s8 }
  0x1d   :  { %p913_p10 = scmp.ne.s32.totalorder %s45_s8, %s912_s1  ;;  %p918_p12 = scmp.lt.s32.totalorder %s912_s1, %s912_s1 }
  0x1f   :  { %p919_p13 = por %p918_p12, %p917_p11 }
  0x21   :  { %p920_p0 = pnand %p919_p13, %p913_p10 }
  0x23   :  { %923 = shalt.err (!%p920_p0)
}
  0x24   :  { %s957_s9 = smov 64   ;;  %s958_s10 = smov 4  }
  0x25   :  { %50 = dma.hbm_to_vmem [thread:$0]  %s1018_s3, 2048, %s45_s8, [#allocation6], %s957_s9, %s957_s9, %s958_s10  }
  0x26   :  { %944 = dma.done.wait [#allocation3], 384  }
  0x27   :  { %945 = vsyncadd [#allocation3], 4294966912 }
  0x28   :  { %946 = dma.done.wait [#allocation6], 8192  }
  0x29   :  { %947 = vsyncadd [#allocation6], 4294959104  ;;  %v959_v0 = vmov 0   ;;  %v772_v1 = vld [vmem:[#allocation5 + $0x74] ss:$8 sps:$4 sm:$0xff]   ;;  %v852_v49 = vld [vmem:[#allocation7 + $0x68] sm:$0xff]  }
  0x2a   :  { %458 = vmatprep.mubr.bf16.mxu1 %v959_v0  ;;  %v774_v2 = vld [vmem:[#allocation5 + $0x70] ss:$8 sps:$4 sm:$0xff]   ;;  %383 = vmatprep.subr.bf16.mxu0 %v772_v1  ;;  %v775_v3 = vld [vmem:[#allocation5 + $0x64] ss:$8 sps:$4 sm:$0xff]   ;;  %v777_v4 = vld [vmem:[#allocation5 + $0x60] ss:$8 sps:$4 sm:$0xff]  }
  0x2b   :  { %384 = vmatpush1.bf16.msra.mxu0 %v774_v2  ;;  %v778_v5 = vld [vmem:[#allocation5 + $0x54] ss:$8 sps:$4 sm:$0xff]   ;;  %v780_v6 = vld [vmem:[#allocation5 + $0x50] ss:$8 sps:$4 sm:$0xff]   ;;  %v781_v7 = vld [vmem:[#allocation5 + $0x44] ss:$8 sps:$4 sm:$0xff]  }
  0x2c   :  { %385 = vmatprep.subr.bf16.mxu0 %v775_v3  ;;  %v783_v8 = vld [vmem:[#allocation5 + $0x40] ss:$8 sps:$4 sm:$0xff]   ;;  %v795_v9 = vld [vmem:[#allocation5 + $0x174] ss:$8 sps:$4 sm:$0xff]   ;;  %v798_v10 = vld [vmem:[#allocation5 + $0x170] ss:$8 sps:$4 sm:$0xff]  }
  0x2d   :  { %v784_v11 = vld [vmem:[#allocation5 + $0x34] ss:$8 sps:$4 sm:$0xff]   ;;  %426 = vmatprep.subr.bf16.mxu1 %v795_v9  ;;  %v801_v12 = vld [vmem:[#allocation5 + $0x164] ss:$8 sps:$4 sm:$0xff]   ;;  %v804_v13 = vld [vmem:[#allocation5 + $0x160] ss:$8 sps:$4 sm:$0xff]  }
  0x2e   :  { %427 = vmatpush1.bf16.msra.mxu1 %v798_v10  ;;  %v786_v14 = vld [vmem:[#allocation5 + $0x30] ss:$8 sps:$4 sm:$0xff]   ;;  %v787_v15 = vld [vmem:[#allocation5 + $0x24] ss:$8 sps:$4 sm:$0xff]   ;;  %v807_v16 = vld [vmem:[#allocation5 + $0x154] ss:$8 sps:$4 sm:$0xff]  }
  0x2f   :  { %386 = vmatpush1.bf16.msra.mxu0 %v777_v4  ;;  %428 = vmatprep.subr.bf16.mxu1 %v801_v12  ;;  %v810_v17 = vld [vmem:[#allocation5 + $0x150] ss:$8 sps:$4 sm:$0xff]   ;;  %v789_v18 = vld [vmem:[#allocation5 + $0x20] ss:$8 sps:$4 sm:$0xff]   ;;  %v813_v19 = vld [vmem:[#allocation5 + $0x144] ss:$8 sps:$4 sm:$0xff]   ;;  %v117_v4 = vlaneseq }
  0x30   :  { %387 = vmatprep.subr.bf16.mxu0 %v778_v5  ;;  %v790_v20 = vld [vmem:[#allocation5 + $0x14] ss:$8 sps:$4 sm:$0xff]   ;;  %v792_v21 = vld [vmem:[#allocation5 + $0x10] ss:$8 sps:$4 sm:$0xff]   ;;  %v816_v22 = vld [vmem:[#allocation5 + $0x140] ss:$8 sps:$4 sm:$0xff]  }
  0x31   :  { %v819_v23 = vld [vmem:[#allocation5 + $0x134] ss:$8 sps:$4 sm:$0xff]   ;;  %v793_v24 = vld [vmem:[#allocation5 + $0x4] ss:$8 sps:$4 sm:$0xff]   ;;  %v822_v25 = vld [vmem:[#allocation5 + $0x130] ss:$8 sps:$4 sm:$0xff]  }
  0x32   :  { %429 = vmatpush1.bf16.msra.mxu1 %v804_v13  ;;  %v797_v26 = vld [vmem:[#allocation5] ss:$8 sps:$4 sm:$0xff]   ;;  %v825_v27 = vld [vmem:[#allocation5 + $0x124] ss:$8 sps:$4 sm:$0xff]   ;;  %v799_v28 = vld [vmem:[#allocation5 + $0xf4] ss:$8 sps:$4 sm:$0xff]  }
  0x33   :  { %388 = vmatpush1.bf16.msra.mxu0 %v780_v6  ;;  %430 = vmatprep.subr.bf16.mxu1 %v807_v16  ;;  %v803_v29 = vld [vmem:[#allocation5 + $0xf0] ss:$8 sps:$4 sm:$0xff]   ;;  %v828_v30 = vld [vmem:[#allocation5 + $0x120] ss:$8 sps:$4 sm:$0xff]   ;;  %v831_v31 = vld [vmem:[#allocation5 + $0x114] ss:$8 sps:$4 sm:$0xff]  }
  0x34   :  { %389 = vmatprep.subr.bf16.mxu0 %v781_v7  ;;  %v805_v32 = vld [vmem:[#allocation5 + $0xe4] ss:$8 sps:$4 sm:$0xff]   ;;  %v809_v33 = vld [vmem:[#allocation5 + $0xe0] ss:$8 sps:$4 sm:$0xff]   ;;  %v834_v34 = vld [vmem:[#allocation5 + $0x110] ss:$8 sps:$4 sm:$0xff]  }
  0x35   :  { %v847_v35 = vld [vmem:[#allocation2 + $0x4] ss:$12 sps:$4 sm:$0xff]   ;;  %v811_v37 = vld [vmem:[#allocation5 + $0xd4] ss:$8 sps:$4 sm:$0xff]   ;;  %v840_v40 = vld [vmem:[#allocation5 + $0x100] ss:$8 sps:$4 sm:$0xff]  }
  0x36   :  { %431 = vmatpush1.bf16.msra.mxu1 %v810_v17  ;;  %v837_v36 = vld [vmem:[#allocation5 + $0x104] ss:$8 sps:$4 sm:$0xff]   ;;  %415 = vmatprep.mubr.bf16.mxu0 %v847_v35  ;;  %v815_v38 = vld [vmem:[#allocation5 + $0xd0] ss:$8 sps:$4 sm:$0xff]   ;;  %v821_v44 = vld [vmem:[#allocation5 + $0xc0] ss:$8 sps:$4 sm:$0xff]  }
  0x37   :  { %390 = vmatpush1.bf16.msra.mxu0 %v783_v8  ;;  %432 = vmatprep.subr.bf16.mxu1 %v813_v19  ;;  %v817_v39 = vld [vmem:[#allocation5 + $0xc4] ss:$8 sps:$4 sm:$0xff]   ;;  %v843_v41 = vld [vmem:[#allocation2 + $0x8] ss:$12 sps:$4 sm:$0xff]   ;;  %v833_v52 = vld [vmem:[#allocation5 + $0xa0] ss:$8 sps:$4 sm:$0xff]  }
  0x38   :  { %391 = vmatprep.subr.bf16.mxu0 %v784_v11  ;;  %v848_v42 = vld [vmem:[#allocation7 + $0x78] sm:$0xff]   ;;  %v850_v45 = vld [vmem:[#allocation7 + $0x70] sm:$0xff]   ;;  %v829_v50 = vld [vmem:[#allocation5 + $0xa4] ss:$8 sps:$4 sm:$0xff]   ;;  %v118_v5 = vshrl.u32 %v117_v4, 7  ;;  %s960_s14 = smov [#allocation8]  }
  0x39   :  { %v849_v43 = vld [vmem:[#allocation7 + $0x38] sm:$0xff]   ;;  %v851_v47 = vld [vmem:[#allocation7 + $0x30] sm:$0xff]   ;;  %v853_v51 = vld [vmem:[#allocation7 + $0x28] sm:$0xff]   ;;  %s658_s15 = sshll.u32 %s960_s14, 4  ;;  %s659_s15 = int_to_ptr.vmem [resolvable:$true] %s658_s15 }
  0x3a   :  { %433 = vmatpush1.bf16.msra.mxu1 %v816_v22  ;;  %v823_v46 = vld [vmem:[#allocation5 + $0xb4] ss:$8 sps:$4 sm:$0xff]   ;;  %v827_v48 = vld [vmem:[#allocation5 + $0xb0] ss:$8 sps:$4 sm:$0xff]   ;;  %v841_v55 = vld [vmem:[#allocation5 + $0x84] ss:$8 sps:$4 sm:$0xff]   ;;  %p929_p2 = scmp.lt.s32.totalorder %s659_s15, %s659_s15 }
  0x3b   :  { %392 = vmatpush1.bf16.msra.mxu0 %v786_v14  ;;  %434 = vmatprep.subr.bf16.mxu1 %v819_v23  ;;  %v835_v53 = vld [vmem:[#allocation5 + $0x94] ss:$8 sps:$4 sm:$0xff]   ;;  %v839_v54 = vld [vmem:[#allocation5 + $0x90] ss:$8 sps:$4 sm:$0xff]   ;;  %v844_v56 = vld [vmem:[#allocation5 + $0x80] ss:$8 sps:$4 sm:$0xff]  }
  0x3c   :  { %393 = vmatprep.subr.bf16.mxu0 %v787_v15  ;;  %v845_v57 = vld [vmem:[#allocation2] ss:$12 sps:$4 sm:$0xff]   ;;  %v854_v58 = vld [vmem:[#allocation7 + $0x60] sm:$0xff]   ;;  %v856_v60 = vld [vmem:[#allocation7 + $0x58] sm:$0xff]   ;;  %v123_v6 = vsub.s32 1, %v118_v5  ;;  %v119_v8 = vsub.s32 0, %v118_v5 }
  0x3d   :  { %v855_v59 = vld [vmem:[#allocation7 + $0x20] sm:$0xff]   ;;  %v857_v61 = vld [vmem:[#allocation7 + $0x18] sm:$0xff]   ;;  %v858_v62 = vld [vmem:[#allocation7 + $0x50] sm:$0xff]   ;;  %s924_s16 = scalar_lea.vmem %s659_s15, 256 }
  0x3e   :  { %435 = vmatpush1.bf16.msra.mxu1 %v822_v25  ;;  %v859_v63 = vld [vmem:[#allocation7 + $0x10] sm:$0xff]   ;;  %v860_v0 = vld [vmem:[#allocation7 + $0x48] sm:$0xff]   ;;  %v862_v2 = vld [vmem:[#allocation7 + $0x40] sm:$0xff]   ;;  %p925_p1 = scmp.ne.s32.totalorder %s659_s15, %s924_s16  ;;  %p930_p3 = scmp.lt.s32.totalorder %s924_s16, %s924_s16 }
  0x3f   :  { %394 = vmatpush1.bf16.msra.mxu0 %v789_v18  ;;  %436 = vmatprep.subr.bf16.mxu1 %v825_v27  ;;  %v861_v1 = vld [vmem:[#allocation7 + $0x8] sm:$0xff]   ;;  %v863_v3 = vld [vmem:[#allocation7] sm:$0xff]  }
  0x40   :  { %395 = vmatprep.subr.bf16.mxu0 %v790_v20  ;;  %v115_v9 = vld [vmem:[%s1017_s2] sm:$0x3]  ;;  %p931_p4 = por %p930_p3, %p929_p2 }
  0x41   :  { %v124_v10 = vrot.slane %v115_v9, %v123_v6  ;;  %v120_v12 = vrot.slane %v115_v9, %v119_v8 }
  0x42   :  { %437 = vmatpush1.bf16.msra.mxu1 %v828_v30  ;;  %p932_p5 = pnand %p931_p4, %p925_p1 }
  0x43   :  { %396 = vmatpush1.bf16.msra.mxu0 %v792_v21  ;;  %438 = vmatprep.subr.bf16.mxu1 %v831_v31 }
  0x44   :  { %397 = vmatprep.subr.bf16.mxu0 %v793_v24 }
  0x46   :  { %439 = vmatpush1.bf16.msra.mxu1 %v834_v34  ;;  %v722_v34 = vld [vmem:[%s1019_s4] ss:$0 sm:$0xff] }
  0x47   :  { %398 = vmatpush1.bf16.msra.mxu0 %v797_v26  ;;  %440 = vmatprep.subr.bf16.mxu1 %v837_v36 }
  0x48   :  { %399 = vmatprep.subr.bf16.mxu0 %v799_v28 }
  0x4a   :  { %441 = vmatpush1.bf16.msra.mxu1 %v840_v40 }
  0x4b   :  { %400 = vmatpush2.bf16.msra.mxu0 %v803_v29  ;;  %739 = vmatprep.subr.bf16.mxu1 %v848_v42 }
  0x4c   :  { %401 = vmatprep.subr.bf16.mxu0 %v805_v32 }
  0x4d   :  { %459 = vmatmul.mubr.bf16.vlgmr.msra.gmra.mxu1 %v843_v41 }
  0x4e   :  { %740 = vmatpush3.bf16.msra.mxu1 %v849_v43 }
  0x4f   :  { %402 = vmatpush2.bf16.msra.mxu0 %v809_v33  ;;  %741 = vmatprep.subr.bf16.mxu1 %v850_v45 }
  0x50   :  { %403 = vmatprep.subr.bf16.mxu0 %v811_v37 }
  0x52   :  { %742 = vmatpush3.bf16.msra.mxu1 %v851_v47 }
  0x53   :  { %404 = vmatpush2.bf16.msra.mxu0 %v815_v38  ;;  %743 = vmatprep.subr.bf16.mxu1 %v852_v49 }
  0x54   :  { %405 = vmatprep.subr.bf16.mxu0 %v817_v39 }
  0x56   :  { %744 = vmatpush3.bf16.msra.mxu1 %v853_v51 }
  0x57   :  { %406 = vmatpush2.bf16.msra.mxu0 %v821_v44  ;;  %745 = vmatprep.subr.bf16.mxu1 %v854_v58 }
  0x58   :  { %407 = vmatprep.subr.bf16.mxu0 %v823_v46 }
  0x5a   :  { %746 = vmatpush3.bf16.msra.mxu1 %v855_v59 }
  0x5b   :  { %408 = vmatpush2.bf16.msra.mxu0 %v827_v48  ;;  %747 = vmatprep.subr.bf16.mxu1 %v856_v60 }
  0x5c   :  { %409 = vmatprep.subr.bf16.mxu0 %v829_v50 }
  0x5e   :  { %748 = vmatpush3.bf16.msra.mxu1 %v857_v61 }
  0x5f   :  { %410 = vmatpush2.bf16.msra.mxu0 %v833_v52  ;;  %749 = vmatprep.subr.bf16.mxu1 %v858_v62 }
  0x60   :  { %411 = vmatprep.subr.bf16.mxu0 %v835_v53 }
  0x62   :  { %750 = vmatpush3.bf16.msra.mxu1 %v859_v63 }
  0x63   :  { %412 = vmatpush2.bf16.msra.mxu0 %v839_v54  ;;  %751 = vmatprep.subr.bf16.mxu1 %v860_v0 }
  0x64   :  { %413 = vmatprep.subr.bf16.mxu0 %v841_v55 }
  0x66   :  { %752 = vmatpush3.bf16.msra.mxu1 %v861_v1 }
  0x67   :  { %414 = vmatpush2.bf16.msra.mxu0 %v844_v56  ;;  %753 = vmatprep.subr.bf16.mxu1 %v862_v2 }
  0x6a   :  { %416 = vmatmul.mubr.bf16.vlgmr.msra.gmra.mxu0 %v845_v57  ;;  %754 = vmatpush3.bf16.msra.mxu1 %v863_v3 }
 0x10d   :  { %v460_v7 = vpop.f32.mrf.mxu1 }
 0x10f   :  { %v462_v11 = vpop.f32.mrf.mxu1 }
 0x111   :  { %v464_v17 = vpop.f32.mrf.mxu1 }
 0x113   :  { %v466_v25 = vpop.f32.mrf.mxu1 }
 0x12a   :  { %v417_v13 = vpop.f32.mrf.mxu0 }
 0x12b   :  { %v418_v16 = vadd.f32 %v417_v13, %v120_v12 }
 0x12c   :  { %v419_v14 = vpop.f32.mrf.mxu0 }
 0x12d   :  { %v420_v15 = vadd.f32 %v419_v14, %v124_v10  ;;  %v461_v24 = vadd.f32 %v460_v7, %v418_v16 }
 0x12e   :  { %v421_v18 = vpop.f32.mrf.mxu0 }
 0x12f   :  { %v422_v19 = vadd.f32 %v421_v18, %v120_v12  ;;  %v463_v21 = vadd.f32 %v462_v11, %v420_v15  ;;  %v469_v30 = vmax.f32 %v461_v24, 0.0 }
 0x130   :  { %v423_v20 = vpop.f32.mrf.mxu0 }
 0x131   :  { %v465_v22 = vadd.f32 %v464_v17, %v422_v19  ;;  %v424_v23 = vadd.f32 %v423_v20, %v124_v10  ;;  %v470_v28 = vmax.f32 %v463_v21, 0.0 }
 0x133   :  { %v467_v26 = vadd.f32 %v466_v25, %v424_v23  ;;  %v471_v27 = vmax.f32 %v465_v22, 0.0 }
 0x135   :  { %v472_v29 = vmax.f32 %v467_v26, 0.0  ;;  %v473_v32 = vpack.c.bf16 %v471_v27, %v469_v30 }
 0x137   :  { %v474_v31 = vpack.c.bf16 %v472_v29, %v470_v28 }
 0x139   :  { %642 = vmatprep.mubr.bf16.mxu1 %v474_v31 }
 0x13a   :  { %643 = vmatmul.mubr.bf16.vlgmr.msra.gmra.mxu1 %v473_v32 }
 0x1fa   :  { %v755_v33 = vpop.f32.mrf.mxu1 }
 0x1fc   :  { %v756_v35 = vpop.f32.mrf.mxu1 }
 0x1fd   :  { %v757_v36 = vadd.f32 %v756_v35, %v755_v33 }
 0x1fe   :  { %v758_v37 = vpop.f32.mrf.mxu1 }
 0x1ff   :  { %v645_v38 = vadd.f32 %v757_v36, %v722_v34 }
 0x200   :  { %v759_v39 = vpop.f32.mrf.mxu1 }
 0x201   :  { %651 = vst [vmem:[#allocation8] sm:$0xff] %v645_v38  ;;  %v760_v40 = vadd.f32 %v759_v39, %v758_v37 }
 0x203   :  { %v648_v41 = vadd.f32 %v760_v40, %v722_v34 }
 0x205   :  { %652 = vst [vmem:[#allocation8 + $0x8] sm:$0xff] %v648_v41 }
 0x206   :  { %935 = shalt.err (!%p932_p5)
}
 0x207   :  { %664 = dma.vmem_to_hbm [thread:$0]  %s659_s15, 256, %s1020_s5, [#allocation4], %s951_s21, %s951_s21, %s952_s22  }
 0x208   :  { %948 = dma.done.wait [#allocation4], 256  }
 0x209   :  { %949 = vsyncadd [#allocation4], 4294967040 }
 0x20a   :  { %668 = vsyncpa [#allocation3], 1 }
 0x20b   :  { %669 = vsyncpa [#allocation6], 1 }
 0x20c   :  { %670 = vsyncpa [#allocation4], 1 }

</bundles_post_ra>
